<compile_context>
chip_gen: v7x
topology: tpu7x:2x2x1
jax: 0.10.0
libtpu: 0.0.40
codegen_flags: <defaults>
</compile_context>

<pallas_src>
import functools

import jax
import jax.numpy as jnp
from jax.experimental import pallas as pl
from jax.experimental.pallas import tpu as pltpu

D = 64  # hidden dim fixed by the module's `sim.repeat(1, 1, 64)`


def _round_up(x, m):
    return -(-x // m) * m


def ws_readout_kernel(seq_ref, q_ref, o_ref, *, mask_tail):
    # seq_ref: (TB, NH, 128)  -- lane-packed pairs of sequence rows
    #          lanes 0:64  = seq[b, 2m, :],  lanes 64:128 = seq[b, 2m+1, :]
    # q_ref:   (TB, 1, 128)   -- query duplicated across both lane halves
    # o_ref:   (TB, 64)
    seq = seq_ref[...].astype(jnp.float32)           # (TB, NH, 128)
    q = q_ref[...].astype(jnp.float32)                # (TB, 1, 128)

    # One lane-dense multiply pass; segmented lane sums give sim for the
    # even / odd sequence positions.
    prod = seq * q                                    # (TB, NH, 128)  VPU
    s_even = jnp.sum(prod[:, :, :D], axis=-1)         # (TB, NH)
    s_odd = jnp.sum(prod[:, :, D:], axis=-1)          # (TB, NH)

    if mask_tail:
        # N was odd: the last odd slot is zero padding -> exclude it from the
        # softmax (its exp must not reach the denominator).
        nh = s_odd.shape[1]
        col = jax.lax.broadcasted_iota(jnp.int32, s_odd.shape, 1)
        s_odd = jnp.where(col == nh - 1, jnp.float32(-1e30), s_odd)

    # Softmax over the full sequence, on compact lane-dense (TB, NH) arrays.
    m = jnp.maximum(jnp.max(s_even, axis=-1, keepdims=True),
                    jnp.max(s_odd, axis=-1, keepdims=True))       # (TB, 1)
    e_even = jnp.exp(s_even - m)                      # dense EUP work
    e_odd = jnp.exp(s_odd - m)
    denom = (jnp.sum(e_even, axis=-1, keepdims=True) +
             jnp.sum(e_odd, axis=-1, keepdims=True))              # (TB, 1)
    inv = 1.0 / denom                                 # exact: only TB values
    a_even = e_even * inv                             # (TB, NH)
    a_odd = e_odd * inv                               # (TB, NH)

    # Attention-weighted sum, still lane-packed; fold the two halves at the end.
    lane = jax.lax.broadcasted_iota(jnp.int32, seq.shape, 2)      # (TB, NH, 128)
    attn = jnp.where(lane < D, a_even[:, :, None], a_odd[:, :, None])
    acc = jnp.sum(seq * attn, axis=1)                 # (TB, 128)  sublane reduce
    out = acc[:, :D] + acc[:, D:]                     # (TB, 64)
    o_ref[...] = out.astype(o_ref.dtype)


def _chip_params():
    """(seq_tile_target_bytes, vmem_limit_default, vmem_cap, min_grid_steps)."""
    kind = ""
    try:
        kind = jax.devices()[0].device_kind.lower()
    except Exception:
        pass
    if "v7" in kind or "7x" in kind:
        # 64 MiB physical VMEM/TC, 3.2 TB/s HBM, 2 TensorCores.
        return (10 << 20, 48 << 20, 56 << 20, 4)
    if "v6" in kind:
        return (8 << 20, 48 << 20, 100 << 20, 1)
    if "v5" in kind:
        return (8 << 20, 40 << 20, 100 << 20, 1)
    return (8 << 20, 40 << 20, 100 << 20, 1)


def _choose_tb(B, bytes_per_batch_row, target_bytes, min_steps):
    """Batch tile size TB (multiple of 8)."""
    tb = max(8, (target_bytes // max(1, bytes_per_batch_row)) // 8 * 8)
    tb = min(tb, _round_up(B, 8))                 # never bigger than needed
    if min_steps > 1:
        # Keep >= min_steps grid steps when B allows (v7x: 2 TCs x 2 buffers).
        per_step = _round_up(-(-B // min_steps), 8)
        tb = min(tb, max(8, per_step))
    return max(8, tb)


def ws_readout(seq, query):
    """seq: (B, N, 64), query: (B, 1, 64) -> (B, 64). Forward of WSReadout."""
    B, N, d = seq.shape
    assert d == D, f"hidden dim must be {D} (module hard-codes repeat to 64)"
    assert query.shape == (B, 1, D)
    itemsize = jnp.dtype(seq.dtype).itemsize

    Np = N + (N % 2)                 # pad N to even so rows pack in lane pairs
    NH = Np // 2
    NH_pad = _round_up(NH, 8)        # sublane padding used for VMEM sizing

    target_bytes, vmem_default, vmem_cap, min_steps = _chip_params()
    bytes_per_row = NH_pad * 2 * D * itemsize
    TB = _choose_tb(B, bytes_per_row, target_bytes, min_steps)

    def _need(tb):
        seq_tile = tb * bytes_per_row
        small = 2 * tb * 8 * 2 * D * itemsize + 2 * tb * 2 * D * itemsize
        # double-buffered seq + ~2 tile-sized intermediates + q/out + slack
        return 4 * seq_tile + small + (2 << 20)

    while TB > 8 and _need(TB) > vmem_cap:
        TB = max(8, (TB // 2 // 8) * 8)
    if _need(TB) > vmem_cap:
        # TODO(synk): tile N with online-softmax accumulators for huge N.
        raise ValueError(
            f"WSReadout Pallas kernel: sequence length N={N} too long for a "
            f"single VMEM tile on this chip; N-axis tiling not implemented.")
    vmem_limit = int(min(vmem_cap, max(vmem_default, _need(TB))))

    Bp = _round_up(B, TB)

    seq_in = seq
    if Bp != B or Np != N:
        # Padded batch rows give out == 0 and are sliced off; the padded odd
        # sequence slot (if any) is masked out of the softmax in-kernel.
        seq_in = jnp.pad(seq, ((0, Bp - B), (0, Np - N), (0, 0)))
    seq_in = seq_in.reshape(Bp, NH, 2 * D)            # free row-major repack

    q_in = query if Bp == B else jnp.pad(query, ((0, Bp - B), (0, 0), (0, 0)))
    q_in = jnp.concatenate([q_in, q_in], axis=-1)     # (Bp, 1, 128)

    kernel = functools.partial(ws_readout_kernel, mask_tail=(Np != N))

    out = pl.pallas_call(
        kernel,
        out_shape=jax.ShapeDtypeStruct((Bp, D), seq.dtype),
        grid_spec=pltpu.PrefetchScalarGridSpec(
            num_scalar_prefetch=0,
            grid=(Bp // TB,),
            in_specs=[
                pl.BlockSpec((TB, NH, 2 * D), lambda b: (b, 0, 0)),
                pl.BlockSpec((TB, 1, 2 * D), lambda b: (b, 0, 0)),
            ],
            out_specs=pl.BlockSpec((TB, D), lambda b: (b, 0)),
        ),
        compiler_params=pltpu.CompilerParams(
            dimension_semantics=("parallel",),
            vmem_limit_bytes=vmem_limit,
        ),
        cost_estimate=pl.CostEstimate(
            flops=int(4 * B * N * D + 5 * B * N),
            transcendentals=int(B * N),
            bytes_accessed=int((B * N * D + 2 * B * D) * itemsize),
        ),
    )(seq_in, q_in)

    return out[:B] if Bp != B else out


def ws_readout_ref(seq, query):
    # Pure-JAX reference mirroring the PyTorch forward exactly.
    q = jnp.transpose(query, (0, 2, 1))               # (B, D, 1)
    sim = jnp.matmul(seq, q)                          # (B, N, 1)
    sim = jax.nn.softmax(sim, axis=1)                 # softmax over N
    sim = jnp.tile(sim, (1, 1, D))                    # (B, N, D)
    return jnp.sum(seq * sim, axis=1)                 # (B, D)


if __name__ == "__main__":
    key = jax.random.PRNGKey(0)
    k1, k2 = jax.random.split(key)
    B, N = 2, 8
    seq = jax.random.normal(k1, (B, N, D), dtype=jnp.float32)
    query = jax.random.normal(k2, (B, 1, D), dtype=jnp.float32)

    out = ws_readout(seq, query)
    jax.block_until_ready(out)

    ref = ws_readout_ref(seq, query)
    assert out.shape == (B, D)
    assert jnp.allclose(out, ref, atol=1e-5, rtol=1e-4), "mismatch vs reference"

    # Odd-N path (packed tail masking) sanity check.
    seq_o = jax.random.normal(k1, (B, 7, D), dtype=jnp.float32)
    out_o = ws_readout(seq_o, query)
    jax.block_until_ready(out_o)
    assert jnp.allclose(out_o, ws_readout_ref(seq_o, query), atol=1e-5, rtol=1e-4)

    print("KERNEL_OK")
</pallas_src>

<mosaic_0001>
module attributes {stable_mosaic.version = 11 : i64} {
  func.func @ws_readout_kernel(%arg0: i32, %arg1: memref<8x4x128xf32, #tpu.memory_space<vmem>>, %arg2: memref<8x1x128xf32, #tpu.memory_space<vmem>>, %arg3: memref<8x64xf32, #tpu.memory_space<vmem>>) attributes {dimension_semantics = [#tpu.dimension_semantics<parallel>], iteration_bounds = array<i64: 1>, scalar_prefetch = 0 : i64, scratch_operands = 0 : i64, tpu.core_type = #tpu.core_type<tc>, window_params = [{transform_indices = @transform_0, window_bounds = array<i64: 8, 4, 128>}, {transform_indices = @transform_1, window_bounds = array<i64: 8, 1, 128>}, {transform_indices = @transform_2, window_bounds = array<i64: 8, 64>}]} {
    %c0 = arith.constant 0 : index
    %c0_0 = arith.constant 0 : index
    %c0_1 = arith.constant 0 : index
    %0 = vector.load %arg1[%c0, %c0_0, %c0_1] : memref<8x4x128xf32, #tpu.memory_space<vmem>>, vector<8x4x128xf32>
    %c0_2 = arith.constant 0 : index
    %c0_3 = arith.constant 0 : index
    %c0_4 = arith.constant 0 : index
    %1 = vector.load %arg2[%c0_2, %c0_3, %c0_4] : memref<8x1x128xf32, #tpu.memory_space<vmem>>, vector<8x1x128xf32>
    %2 = vector.broadcast %1 : vector<8x1x128xf32> to vector<8x4x128xf32>
    %3 = arith.mulf %0, %2 : vector<8x4x128xf32>
    %4 = vector.extract_strided_slice %3 {offsets = [0, 0, 0], sizes = [8, 4, 64], strides = [1, 1, 1]} : vector<8x4x128xf32> to vector<8x4x64xf32>
    %cst = arith.constant dense<0.000000e+00> : vector<8x4xf32>
    %5 = vector.multi_reduction <add>, %4, %cst [2] : vector<8x4x64xf32> to vector<8x4xf32>
    %6 = vector.extract_strided_slice %3 {offsets = [0, 0, 64], sizes = [8, 4, 64], strides = [1, 1, 1]} : vector<8x4x128xf32> to vector<8x4x64xf32>
    %cst_5 = arith.constant dense<0.000000e+00> : vector<8x4xf32>
    %7 = vector.multi_reduction <add>, %6, %cst_5 [2] : vector<8x4x64xf32> to vector<8x4xf32>
    %cst_6 = arith.constant dense<0xFF800000> : vector<8xf32>
    %8 = vector.multi_reduction <maximumf>, %5, %cst_6 [1] : vector<8x4xf32> to vector<8xf32>
    %9 = vector.shape_cast %8 : vector<8xf32> to vector<8x1xf32>
    %cst_7 = arith.constant dense<0xFF800000> : vector<8xf32>
    %10 = vector.multi_reduction <maximumf>, %7, %cst_7 [1] : vector<8x4xf32> to vector<8xf32>
    %11 = vector.shape_cast %10 : vector<8xf32> to vector<8x1xf32>
    %12 = arith.maximumf %9, %11 : vector<8x1xf32>
    %13 = vector.broadcast %12 : vector<8x1xf32> to vector<8x4xf32>
    %14 = arith.subf %5, %13 : vector<8x4xf32>
    %15 = math.exp %14 : vector<8x4xf32>
    %16 = vector.broadcast %12 : vector<8x1xf32> to vector<8x4xf32>
    %17 = arith.subf %7, %16 : vector<8x4xf32>
    %18 = math.exp %17 : vector<8x4xf32>
    %cst_8 = arith.constant dense<0.000000e+00> : vector<8xf32>
    %19 = vector.multi_reduction <add>, %15, %cst_8 [1] : vector<8x4xf32> to vector<8xf32>
    %20 = vector.shape_cast %19 : vector<8xf32> to vector<8x1xf32>
    %cst_9 = arith.constant dense<0.000000e+00> : vector<8xf32>
    %21 = vector.multi_reduction <add>, %18, %cst_9 [1] : vector<8x4xf32> to vector<8xf32>
    %22 = vector.shape_cast %21 : vector<8xf32> to vector<8x1xf32>
    %23 = arith.addf %20, %22 : vector<8x1xf32>
    %cst_10 = arith.constant 1.000000e+00 : f32
    %24 = vector.broadcast %cst_10 : f32 to vector<8x1xf32>
    %25 = arith.divf %24, %23 : vector<8x1xf32>
    %26 = vector.broadcast %25 : vector<8x1xf32> to vector<8x4xf32>
    %27 = arith.mulf %15, %26 : vector<8x4xf32>
    %28 = vector.broadcast %25 : vector<8x1xf32> to vector<8x4xf32>
    %29 = arith.mulf %18, %28 : vector<8x4xf32>
    %30 = tpu.iota {dimensions = array<i32: 2>} : vector<8x4x128xi32>
    %c64_i32 = arith.constant 64 : i32
    %31 = vector.broadcast %c64_i32 : i32 to vector<8x4x128xi32>
    %32 = arith.cmpi slt, %30, %31 : vector<8x4x128xi32>
    %33 = vector.shape_cast %27 : vector<8x4xf32> to vector<8x4x1xf32>
    %34 = vector.shape_cast %29 : vector<8x4xf32> to vector<8x4x1xf32>
    %35 = vector.shape_cast %33 : vector<8x4x1xf32> to vector<8x4x1xf32>
    %36 = vector.broadcast %35 : vector<8x4x1xf32> to vector<8x4x128xf32>
    %37 = vector.shape_cast %34 : vector<8x4x1xf32> to vector<8x4x1xf32>
    %38 = vector.broadcast %37 : vector<8x4x1xf32> to vector<8x4x128xf32>
    %39 = arith.select %32, %36, %38 : vector<8x4x128xi1>, vector<8x4x128xf32>
    %40 = arith.mulf %0, %39 : vector<8x4x128xf32>
    %cst_11 = arith.constant dense<0.000000e+00> : vector<8x128xf32>
    %41 = vector.multi_reduction <add>, %40, %cst_11 [1] : vector<8x4x128xf32> to vector<8x128xf32>
    %42 = vector.extract_strided_slice %41 {offsets = [0, 0], sizes = [8, 64], strides = [1, 1]} : vector<8x128xf32> to vector<8x64xf32>
    %43 = vector.extract_strided_slice %41 {offsets = [0, 64], sizes = [8, 64], strides = [1, 1]} : vector<8x128xf32> to vector<8x64xf32>
    %44 = arith.addf %42, %43 : vector<8x64xf32>
    %c0_12 = arith.constant 0 : index
    %c0_13 = arith.constant 0 : index
    %45 = vector.load %arg3[%c0_12, %c0_13] : memref<8x64xf32, #tpu.memory_space<vmem>>, vector<8x64xf32>
    tpu.vector_store %arg3[%c0_12, %c0_13], %44 {strides = array<i32>} : memref<8x64xf32, #tpu.memory_space<vmem>>, vector<8x64xf32>,
    return
  }
  func.func @transform_0(%arg0: i32) -> (i32, i32, i32) {
    %c0_i32 = arith.constant 0 : i32
    %c0_i32_0 = arith.constant 0 : i32
    %c0_i32_1 = arith.constant 0 : i32
    return %arg0, %c0_i32, %c0_i32_0 : i32, i32, i32
  }
  func.func @transform_1(%arg0: i32) -> (i32, i32, i32) {
    %c0_i32 = arith.constant 0 : i32
    %c0_i32_0 = arith.constant 0 : i32
    %c0_i32_1 = arith.constant 0 : i32
    return %arg0, %c0_i32, %c0_i32_0 : i32, i32, i32
  }
  func.func @transform_2(%arg0: i32) -> (i32, i32) {
    %c0_i32 = arith.constant 0 : i32
    %c0_i32_0 = arith.constant 0 : i32
    return %arg0, %c0_i32 : i32, i32
  }
}

</mosaic_0001>

<bundles_post_ra>
// kernel: tpu_custom_call.1
= control target key start
LH: loop header
LB: loop body
LE: loop exit
PB: predicated region body
PF: predicated region fallthrough
CT: control target
= control target key end

     0   :  { %7 = vsyncpa [#allocation3], 0  ;;  %s1373_s0 = inlined_call_operand.hbm [shape: f32[8,4,128], index: 0, kind: input, shape index: {}]   ;;  %s1374_s1 = inlined_call_operand.hbm [shape: f32[8,1,128], index: 1, kind: input, shape index: {}]   ;;  %s1375_s2 = inlined_call_operand.hbm [shape: f32[8,64], index: 2, kind: output, shape index: {}]  }
   0x1   :  { %8 = vsyncpa [#allocation6], 0 }
   0x2   :  { %9 = vsyncpa [#allocation4], 0  ;;  %s964_s9 = smov [#allocation2]   ;;  %s892_s13 = scalar_lea.hbm %s1373_s0, 512 }
   0x3   :  { %s15_s10 = sshll.u32 %s964_s9, 4  ;;  %p893_p0 = scmp.ne.s32.totalorder %s1373_s0, %s892_s13  ;;  %s16_s10 = int_to_ptr.vmem [resolvable:$true] %s15_s10 }
   0x4   :  { %p896_p1 = scmp.lt.u32.totalorder %s892_s13, %s1373_s0 }
   0x6   :  { %p898_p2 = pnand %p896_p1, %p893_p0 }
   0x8   :  { %901 = shalt.err (!%p898_p2)
}
   0x9   :  { %s902_s18 = scalar_lea.vmem %s16_s10, 512  ;;  %p907_p4 = scmp.lt.s32.totalorder %s16_s10, %s16_s10 }
   0xa   :  { %p903_p3 = scmp.ne.s32.totalorder %s16_s10, %s902_s18  ;;  %p908_p5 = scmp.lt.s32.totalorder %s902_s18, %s902_s18 }
   0xc   :  { %p909_p6 = por %p908_p5, %p907_p4 }
   0xe   :  { %p910_p7 = pnand %p909_p6, %p903_p3 }
  0x10   :  { %913 = shalt.err (!%p910_p7)
}
  0x11   :  { %s965_s19 = smov 64   ;;  %s966_s20 = smov 4  }
  0x12   :  { %21 = dma.hbm_to_vmem [thread:$0]  %s1373_s0, 512, %s16_s10, [#allocation3], %s965_s19, %s965_s19, %s966_s20  }
  0x13   :  { %s967_s23 = smov [#allocation5]   ;;  %s914_s27 = scalar_lea.hbm %s1374_s1, 128 }
  0x14   :  { %s27_s24 = sshll.u32 %s967_s23, 4  ;;  %p915_p8 = scmp.ne.s32.totalorder %s1374_s1, %s914_s27  ;;  %s28_s24 = int_to_ptr.vmem [resolvable:$true] %s27_s24 }
  0x15   :  { %p918_p9 = scmp.lt.u32.totalorder %s914_s27, %s1374_s1 }
  0x17   :  { %p920_p10 = pnand %p918_p9, %p915_p8 }
  0x19   :  { %923 = shalt.err (!%p920_p10)
}
  0x1a   :  { %s924_s4 = scalar_lea.vmem %s28_s24, 128  ;;  %p929_p12 = scmp.lt.s32.totalorder %s28_s24, %s28_s24 }
  0x1b   :  { %p925_p11 = scmp.ne.s32.totalorder %s28_s24, %s924_s4  ;;  %p930_p13 = scmp.lt.s32.totalorder %s924_s4, %s924_s4 }
  0x1d   :  { %p931_p0 = por %p930_p13, %p929_p12 }
  0x1f   :  { %p932_p1 = pnand %p931_p0, %p925_p11 }
  0x21   :  { %935 = shalt.err (!%p932_p1)
}
  0x22   :  { %s968_s0 = smov 16   ;;  %s969_s5 = smov 1  }
  0x23   :  { %33 = dma.hbm_to_vmem [thread:$0]  %s1374_s1, 128, %s28_s24, [#allocation6], %s968_s0, %s968_s0, %s969_s5  }
  0x24   :  { %958 = dma.done.wait [#allocation3], 512  }
  0x25   :  { %959 = vsyncadd [#allocation3], 4294966784 }
  0x26   :  { %960 = dma.done.wait [#allocation6], 128  }
  0x27   :  { %961 = vsyncadd [#allocation6], 4294967168  ;;  %v1013_v0 = vld [vmem:[#allocation2] sm:$0xf]  ;;  %v1015_v2 = vld [vmem:[#allocation2 + $0x4] sm:$0xf]  ;;  %v201_v48 = vlaneseq }
  0x28   :  { %v840_v1 = vld [vmem:[#allocation5] ss:$0 sm:$0xff]  ;;  %v841_v4 = vld [vmem:[#allocation5 + $0x1] ss:$0 sm:$0xff]  ;;  %v1018_v5 = vld [vmem:[#allocation2 + $0x8] sm:$0xf] }
  0x29   :  { %v104_v3 = vmul.f32 %v840_v1, %v1013_v0  ;;  %v842_v6 = vld [vmem:[#allocation5 + $0x2] ss:$0 sm:$0xff]  ;;  %v1021_v8 = vld [vmem:[#allocation2 + $0xc] sm:$0xf]  ;;  %v843_v9 = vld [vmem:[#allocation5 + $0x3] ss:$0 sm:$0xff]  ;;  %v105_v10 = vmul.f32 %v841_v4, %v1015_v2 }
  0x2a   :  { %v106_v7 = vmul.f32 %v842_v6, %v1018_v5  ;;  %v107_v11 = vmul.f32 %v843_v9, %v1021_v8  ;;  %v1027_v12 = vld [vmem:[#allocation2 + $0x10] sm:$0xf]  ;;  %v844_v13 = vld [vmem:[#allocation5 + $0x4] ss:$0 sm:$0xff]  ;;  %v1029_v14 = vld [vmem:[#allocation2 + $0x14] sm:$0xf] }
  0x2b   :  { %145 = vrot.lane.b32.xlu0 %v104_v3, %s965_s19  ;;  %v845_v15 = vld [vmem:[#allocation5 + $0x5] ss:$0 sm:$0xff]  ;;  %v108_v16 = vmul.f32 %v844_v13, %v1027_v12  ;;  %v1035_v18 = vld [vmem:[#allocation2 + $0x18] sm:$0xf]  ;;  %v846_v19 = vld [vmem:[#allocation5 + $0x6] ss:$0 sm:$0xff] }
  0x2c   :  { %149 = vrot.lane.b32.xlu1 %v106_v7, %s965_s19  ;;  %v109_v17 = vmul.f32 %v845_v15, %v1029_v14  ;;  %v1037_v20 = vld [vmem:[#allocation2 + $0x1c] sm:$0xf]  ;;  %v847_v21 = vld [vmem:[#allocation5 + $0x7] ss:$0 sm:$0xff]  ;;  %v110_v22 = vmul.f32 %v846_v19, %v1035_v18  ;;  %vm112_vm0 = vcmask 519168   ;;  %v1061_v49 = vand.u32 127, %v201_v48 }
  0x2d   :  { %v111_v23 = vmul.f32 %v847_v21, %v1037_v20  ;;  %v113_v24 = vsel %vm112_vm0, %v104_v3, 0.0  ;;  %v116_v25 = vsel %vm112_vm0, %v105_v10, 0.0  ;;  %v119_v26 = vsel %vm112_vm0, %v106_v7, 0.0  ;;  %s971_s1 = smov [#allocation7]  }
  0x2e   :  { %v122_v27 = vsel %vm112_vm0, %v107_v11, 0.0  ;;  %v125_v28 = vsel %vm112_vm0, %v108_v16, 0.0  ;;  %v128_v29 = vsel %vm112_vm0, %v109_v17, 0.0  ;;  %v131_v30 = vsel %vm112_vm0, %v110_v22, 0.0  ;;  %s830_s8 = sshll.u32 %s971_s1, 4  ;;  %s831_s8 = int_to_ptr.vmem [resolvable:$true] %s830_s8 }
  0x2f   :  { %147 = vrot.lane.b32.xlu0 %v105_v10, %s965_s19  ;;  %v134_v31 = vsel %vm112_vm0, %v111_v23, 0.0  ;;  %v1063_v50 = vshrl.u32 %v201_v48, 7  ;;  %vm235_vm1 = vcmask 1041409   ;;  %vm237_vm2 = vcmask 1042434   ;;  %s936_s9 = scalar_lea.vmem %s831_s8, 128  ;;  %p941_p3 = scmp.lt.s32.totalorder %s831_s8, %s831_s8 }
  0x30   :  { %151 = vrot.lane.b32.xlu1 %v107_v11, %s965_s19  ;;  %vm239_vm3 = vcmask 1043459   ;;  %vm241_vm4 = vcmask 1044484   ;;  %vm243_vm5 = vcmask 1045509   ;;  %vm245_vm6 = vcmask 1046534   ;;  %p937_p2 = scmp.ne.s32.totalorder %s831_s8, %s936_s9  ;;  %p942_p4 = scmp.lt.s32.totalorder %s936_s9, %s936_s9 }
  0x31   :  { %v1069_v52 = vsub.s32 %v1061_v49, %v1063_v50  ;;  %vm247_vm7 = vcmask 1047559   ;;  %vm250_vm8 = vcmask 31744   ;;  %vm605_vm9 = vcmp.lt.s32.totalorder %v1061_v49, 64 }
  0x32   :  { %vm702_vm10 = vcmask 1043456   ;;  %vm822_vm11 = vcmask 523264   ;;  %p943_p5 = por %p942_p4, %p941_p3 }
  0x33   :  { %153 = vrot.lane.b32.xlu0 %v108_v16, %s965_s19 }
  0x34   :  { %155 = vrot.lane.b32.xlu1 %v109_v17, %s965_s19  ;;  %p944_p6 = pnand %p943_p5, %p937_p2 }
  0x37   :  { %157 = vrot.lane.b32.xlu0 %v110_v22, %s965_s19 }
  0x38   :  { %159 = vrot.lane.b32.xlu1 %v111_v23, %s965_s19 }
  0x56   :  { %114 = vadd.xlane.f32.xlu0 %v113_v24 }
  0x5c   :  { %117 = vadd.xlane.f32.xlu1 %v116_v25 }
  0x60   :  { %120 = vadd.xlane.f32.xlu1 %v119_v26 }
  0x64   :  { %123 = vadd.xlane.f32.xlu1 %v122_v27 }
  0x68   :  { %126 = vadd.xlane.f32.xlu1 %v125_v28 }
  0x6c   :  { %129 = vadd.xlane.f32.xlu1 %v128_v29 }
  0x70   :  { %132 = vadd.xlane.f32.xlu1 %v131_v30 }
  0x74   :  { %135 = vadd.xlane.f32.xlu1 %v134_v31 }
  0x9d   :  { %v146_v32 = vpop.permute.xlu0 %145 }
  0x9e   :  { %v169_v33 = vsel %vm112_vm0, %v146_v32, 0.0  ;;  %v150_v34 = vpop.permute.xlu1 %149 }
  0x9f   :  { %170 = vadd.xlane.f32.xlu0 %v169_v33  ;;  %v175_v37 = vsel %vm112_vm0, %v150_v34, 0.0 }
  0xa1   :  { %v148_v35 = vpop.permute.xlu0 %147 }
  0xa2   :  { %v172_v36 = vsel %vm112_vm0, %v148_v35, 0.0  ;;  %v152_v38 = vpop.permute.xlu1 %151 }
  0xa3   :  { %173 = vadd.xlane.f32.xlu0 %v172_v36  ;;  %v178_v39 = vsel %vm112_vm0, %v152_v38, 0.0 }
  0xa5   :  { %v154_v40 = vpop.permute.xlu0 %153 }
  0xa6   :  { %v181_v41 = vsel %vm112_vm0, %v154_v40, 0.0  ;;  %v156_v42 = vpop.permute.xlu1 %155 }
  0xa7   :  { %176 = vadd.xlane.f32.xlu0 %v175_v37  ;;  %v184_v43 = vsel %vm112_vm0, %v156_v42, 0.0 }
  0xa9   :  { %v158_v44 = vpop.permute.xlu0 %157 }
  0xaa   :  { %v187_v45 = vsel %vm112_vm0, %v158_v44, 0.0  ;;  %v160_v46 = vpop.permute.xlu1 %159  ;;  %v970_v44 = vmov 0  }
  0xab   :  { %179 = vadd.xlane.f32.xlu0 %v178_v39  ;;  %v190_v47 = vsel %vm112_vm0, %v160_v46, 0.0  ;;  %856 = vset.pattern.permute.xlu1 %v970_v44  ;;  %v309_v46 = vsub.s32 0, %v1063_v50 }
  0xac   :  { %857 = vset.pattern.permute.xlu0 %v970_v44 }
  0xaf   :  { %182 = vadd.xlane.f32.xlu0 %v181_v41 }
  0xb3   :  { %185 = vadd.xlane.f32.xlu0 %v184_v43 }
  0xb7   :  { %188 = vadd.xlane.f32.xlu0 %v187_v45  ;;  %v313_v45 = vsub.s32 1, %v1063_v50 }
  0xbb   :  { %191 = vadd.xlane.f32.xlu0 %v190_v47  ;;  %v329_v47 = vsub.s32 5, %v1063_v50 }
  0xe3   :  { %v1071_v53 = vpop.xlane.xlu0 %114 }
  0xe4   :  { %v206_v56 = vrot.slane %v1071_v53, %v1069_v52 }
  0xe9   :  { %v1065_v51 = vpop.xlane.xlu1 %117 }
  0xea   :  { %v210_v55 = vrot.slane %v1065_v51, %v1069_v52 }
  0xec   :  { %v236_v59 = vsel %vm235_vm1, %v210_v55, %v206_v56 }
  0xed   :  { %v1073_v54 = vpop.xlane.xlu1 %120 }
  0xee   :  { %v214_v57 = vrot.slane %v1073_v54, %v1069_v52 }
  0xf0   :  { %v238_v62 = vsel %vm237_vm2, %v214_v57, %v236_v59  ;;  %v333_v57 = vsub.s32 6, %v1063_v50 }
  0xf1   :  { %v1081_v58 = vpop.xlane.xlu1 %123 }
  0xf2   :  { %v218_v60 = vrot.slane %v1081_v58, %v1069_v52 }
  0xf4   :  { %v240_v1 = vsel %vm239_vm3, %v218_v60, %v238_v62 }
  0xf5   :  { %v1086_v61 = vpop.xlane.xlu1 %126 }
  0xf6   :  { %v222_v63 = vrot.slane %v1086_v61, %v1069_v52 }
  0xf8   :  { %v242_v6 = vsel %vm241_vm4, %v222_v63, %v240_v1  ;;  %v337_v63 = vsub.s32 7, %v1063_v50 }
  0xf9   :  { %v1092_v3 = vpop.xlane.xlu1 %129 }
  0xfa   :  { %v226_v4 = vrot.slane %v1092_v3, %v1069_v52 }
  0xfc   :  { %v244_v10 = vsel %vm243_vm5, %v226_v4, %v242_v6 }
  0xfd   :  { %v1097_v7 = vpop.xlane.xlu1 %132 }
  0xfe   :  { %v230_v9 = vrot.slane %v1097_v7, %v1069_v52 }
 0x100   :  { %v246_v13 = vsel %vm245_vm6, %v230_v9, %v244_v10 }
 0x101   :  { %v1102_v11 = vpop.xlane.xlu1 %135 }
 0x102   :  { %v234_v15 = vrot.slane %v1102_v11, %v1069_v52 }
 0x104   :  { %v248_v16 = vsel %vm247_vm7, %v234_v15, %v246_v13  ;;  %v317_v13 = vsub.s32 2, %v1063_v50 }
 0x105   :  { %v251_v17 = vsel %vm250_vm8, %v248_v16, -inf }
 0x106   :  { %252 = vmax.xlane.f32.xlu1 %v251_v17 }
 0x12c   :  { %v171_v19 = vpop.xlane.xlu0 %170 }
 0x12d   :  { %v265_v28 = vrot.slane %v171_v19, %v1069_v52 }
 0x130   :  { %v174_v21 = vpop.xlane.xlu0 %173 }
 0x131   :  { %v269_v26 = vrot.slane %v174_v21, %v1069_v52 }
 0x133   :  { %v294_v32 = vsel %vm235_vm1, %v269_v26, %v265_v28 }
 0x134   :  { %v1109_v22 = vpop.xlane.xlu0 %176 }
 0x135   :  { %v273_v27 = vrot.slane %v1109_v22, %v1069_v52 }
 0x137   :  { %v295_v34 = vsel %vm237_vm2, %v273_v27, %v294_v32 }
 0x138   :  { %v1111_v23 = vpop.xlane.xlu0 %179 }
 0x139   :  { %v277_v29 = vrot.slane %v1111_v23, %v1069_v52 }
 0x13b   :  { %v296_v36 = vsel %vm239_vm3, %v277_v29, %v295_v34 }
 0x13c   :  { %v1113_v24 = vpop.xlane.xlu0 %182 }
 0x13d   :  { %v281_v30 = vrot.slane %v1113_v24, %v1069_v52 }
 0x13f   :  { %v297_v37 = vsel %vm241_vm4, %v281_v30, %v296_v36 }
 0x140   :  { %v1115_v25 = vpop.xlane.xlu0 %185 }
 0x141   :  { %v285_v33 = vrot.slane %v1115_v25, %v1069_v52 }
 0x143   :  { %v298_v40 = vsel %vm243_vm5, %v285_v33, %v297_v37  ;;  %v325_v37 = vsub.s32 4, %v1063_v50 }
 0x144   :  { %v1125_v31 = vpop.xlane.xlu0 %188 }
 0x145   :  { %v289_v35 = vrot.slane %v1125_v31, %v1069_v52 }
 0x147   :  { %v299_v41 = vsel %vm245_vm6, %v289_v35, %v298_v40 }
 0x148   :  { %v1135_v38 = vpop.xlane.xlu0 %191 }
 0x149   :  { %v293_v39 = vrot.slane %v1135_v38, %v1069_v52 }
 0x14b   :  { %v300_v42 = vsel %vm247_vm7, %v293_v39, %v299_v41 }
 0x14c   :  { %v302_v43 = vsel %vm250_vm8, %v300_v42, -inf }
 0x14d   :  { %303 = vmax.xlane.f32.xlu0 %v302_v43 }
 0x193   :  { %v253_v48 = vpop.xlane.xlu1 %252 }
 0x1da   :  { %v304_v55 = vpop.xlane.xlu0 %303 }
 0x1db   :  { %v305_v56 = vmax.f32 %v253_v48, %v304_v55 }
 0x1dd   :  { %v314_v59 = vrot.slane %v305_v56, %v313_v45  ;;  %v310_v60 = vrot.slane %v305_v56, %v309_v46  ;;  %v1153_v62 = vrot.slane %v305_v56, %v329_v47  ;;  %v1162_v9 = vrot.slane %v305_v56, %v333_v57 }
 0x1de   :  { %v318_v27 = vrot.slane %v305_v56, %v317_v13  ;;  %v326_v42 = vrot.slane %v305_v56, %v325_v37 }
 0x1df   :  { %v348_v1 = vsub.f32 %v1065_v51, %v314_v59  ;;  %v347_v4 = vsub.f32 %v1071_v53, %v310_v60  ;;  %v352_v6 = vsub.f32 %v1092_v3, %v1153_v62  ;;  %v371_v10 = vsub.f32 %v171_v19, %v310_v60 }
 0x1e0   :  { %v353_v26 = vsub.f32 %v1097_v7, %v1162_v9  ;;  %v1169_v51 = vrot.slane %v305_v56, %v337_v63  ;;  %v372_v3 = vsub.f32 %v174_v21, %v314_v59  ;;  %v349_v30 = vsub.f32 %v1073_v54, %v318_v27 }
 0x1e1   :  { %v357_v15 = vmul.f32 1.442695, %v348_v1  ;;  %v355_v16 = vmul.f32 1.442695, %v347_v4  ;;  %v365_v17 = vmul.f32 1.442695, %v352_v6  ;;  %v373_v21 = vsub.f32 %v1109_v22, %v318_v27 }
 0x1e2   :  { %v379_v53 = vmul.f32 1.442695, %v371_v10  ;;  %v367_v19 = vmul.f32 1.442695, %v353_v26  ;;  %v354_v28 = vsub.f32 %v1102_v11, %v1169_v51  ;;  %v381_v29 = vmul.f32 1.442695, %v372_v3 }
 0x1e3   :  { %858 = vpow2.f32 %v357_v15  ;;  %v321_v7 = vsub.s32 3, %v1063_v50  ;;  %v359_v33 = vmul.f32 1.442695, %v349_v30  ;;  %v383_v54 = vmul.f32 1.442695, %v373_v21 }
 0x1e4   :  { %860 = vpow2.f32 %v355_v16  ;;  %v369_v32 = vmul.f32 1.442695, %v354_v28  ;;  %v351_v48 = vsub.f32 %v1086_v61, %v326_v42  ;;  %v376_v61 = vsub.f32 %v1115_v25, %v1153_v62 }
 0x1e5   :  { %862 = vpow2.f32 %v365_v17  ;;  %v322_v34 = vrot.slane %v305_v56, %v321_v7  ;;  %v375_v56 = vsub.f32 %v1113_v24, %v326_v42  ;;  %v377_v10 = vsub.f32 %v1125_v31, %v1162_v9 }
 0x1e6   :  { %864 = vpow2.f32 %v379_v53  ;;  %v389_v6 = vmul.f32 1.442695, %v376_v61  ;;  %v378_v16 = vsub.f32 %v1135_v38, %v1169_v51 }
 0x1e7   :  { %866 = vpow2.f32 %v367_v19  ;;  %v350_v11 = vsub.f32 %v1081_v58, %v322_v34  ;;  %v374_v41 = vsub.f32 %v1111_v23, %v322_v34  ;;  %v363_v23 = vmul.f32 1.442695, %v351_v48 }
 0x1e8   :  { %868 = vpow2.f32 %v381_v29  ;;  %v387_v1 = vmul.f32 1.442695, %v375_v56  ;;  %v391_v24 = vmul.f32 1.442695, %v377_v10  ;;  %v393_v25 = vmul.f32 1.442695, %v378_v16 }
 0x1e9   :  { %870 = vpow2.f32 %v369_v32  ;;  %v361_v40 = vmul.f32 1.442695, %v350_v11  ;;  %v385_v44 = vmul.f32 1.442695, %v374_v41 }
 0x1ea   :  { %872 = vpow2.f32 %v359_v33 }
 0x1eb   :  { %874 = vpow2.f32 %v383_v54 }
 0x1ec   :  { %876 = vpow2.f32 %v361_v40 }
 0x1ed   :  { %v1180_v35 = vpop.eup %858  ;;  %878 = vpow2.f32 %v385_v44 }
 0x1ee   :  { %v1182_v36 = vpop.eup %860  ;;  %407 = vperm.xlu0 %857, %v1180_v35   ;;  %880 = vpow2.f32 %v363_v23 }
 0x1ef   :  { %404 = vperm.xlu1 %856, %v1182_v36   ;;  %v1188_v39 = vpop.eup %862  ;;  %882 = vpow2.f32 %v387_v1 }
 0x1f0   :  { %v1190_v22 = vpop.eup %864  ;;  %884 = vpow2.f32 %v389_v6 }
 0x1f1   :  { %v1197_v43 = vpop.eup %866  ;;  %886 = vpow2.f32 %v391_v24 }
 0x1f2   :  { %419 = vperm.xlu0 %857, %v1188_v39   ;;  %v1199_v58 = vpop.eup %868  ;;  %888 = vpow2.f32 %v393_v25 }
 0x1f3   :  { %479 = vperm.xlu1 %856, %v1190_v22   ;;  %v1204_v55 = vpop.eup %870 }
 0x1f4   :  { %v1206_v59 = vpop.eup %872 }
 0x1f5   :  { %v1211_v60 = vpop.eup %874 }
 0x1f6   :  { %422 = vperm.xlu0 %857, %v1197_v43   ;;  %v1216_v4 = vpop.eup %876 }
 0x1f7   :  { %482 = vperm.xlu1 %856, %v1199_v58   ;;  %v1221_v15 = vpop.eup %878 }
 0x1f8   :  { %v1226_v17 = vpop.eup %880 }
 0x1f9   :  { %v1229_v62 = vpop.eup %882 }
 0x1fa   :  { %425 = vperm.xlu0 %857, %v1204_v55   ;;  %v1232_v31 = vpop.eup %884 }
 0x1fb   :  { %410 = vperm.xlu1 %856, %v1206_v59   ;;  %v1235_v9 = vpop.eup %886 }
 0x1fc   :  { %v1238_v38 = vpop.eup %888 }
 0x1ff   :  { %485 = vperm.xlu1 %856, %v1211_v60  }
 0x203   :  { %413 = vperm.xlu1 %856, %v1216_v4  }
 0x207   :  { %488 = vperm.xlu1 %856, %v1221_v15  }
 0x20b   :  { %416 = vperm.xlu1 %856, %v1226_v17  }
 0x20f   :  { %491 = vperm.xlu1 %856, %v1229_v62  }
 0x213   :  { %494 = vperm.xlu1 %856, %v1232_v31  }
 0x217   :  { %497 = vperm.xlu1 %856, %v1235_v9  }
 0x21b   :  { %500 = vperm.xlu1 %856, %v1238_v38  }
 0x26d   :  { %v408_v3 = vpop.permute.xlu0 %407 }
 0x26e   :  { %v405_v26 = vpop.permute.xlu1 %404  ;;  %v434_v32 = vrot.slane %v408_v3, %v1069_v52 }
 0x26f   :  { %v430_v33 = vrot.slane %v405_v26, %v1069_v52 }
 0x271   :  { %v420_v28 = vpop.permute.xlu0 %419  ;;  %v459_v11 = vsel %vm235_vm1, %v434_v32, %v430_v33 }
 0x272   :  { %v480_v51 = vpop.permute.xlu1 %479  ;;  %v450_v48 = vrot.slane %v420_v28, %v1069_v52 }
 0x273   :  { %v505_v28 = vrot.slane %v480_v51, %v1069_v52 }
 0x275   :  { %v423_v30 = vpop.permute.xlu0 %422 }
 0x276   :  { %v483_v53 = vpop.permute.xlu1 %482  ;;  %v454_v56 = vrot.slane %v423_v30, %v1069_v52 }
 0x277   :  { %v509_v3 = vrot.slane %v483_v53, %v1069_v52 }
 0x279   :  { %v426_v41 = vpop.permute.xlu0 %425  ;;  %v534_v33 = vsel %vm235_vm1, %v509_v3, %v505_v28 }
 0x27a   :  { %v411_v27 = vpop.permute.xlu1 %410  ;;  %v458_v61 = vrot.slane %v426_v41, %v1069_v52 }
 0x27b   :  { %v438_v34 = vrot.slane %v411_v27, %v1069_v52 }
 0x27d   :  { %v460_v42 = vsel %vm237_vm2, %v438_v34, %v459_v11 }
 0x27e   :  { %v486_v19 = vpop.permute.xlu1 %485 }
 0x27f   :  { %v513_v27 = vrot.slane %v486_v19, %v1069_v52 }
 0x282   :  { %v414_v29 = vpop.permute.xlu1 %413 }
 0x283   :  { %v442_v54 = vrot.slane %v414_v29, %v1069_v52 }
 0x285   :  { %v461_v23 = vsel %vm239_vm3, %v442_v54, %v460_v42  ;;  %v535_v54 = vsel %vm237_vm2, %v513_v27, %v534_v33 }
 0x286   :  { %v489_v21 = vpop.permute.xlu1 %488 }
 0x287   :  { %v517_v29 = vrot.slane %v489_v21, %v1069_v52 }
 0x28a   :  { %v417_v40 = vpop.permute.xlu1 %416 }
 0x28b   :  { %v446_v44 = vrot.slane %v417_v40, %v1069_v52  ;;  %v536_v40 = vsel %vm239_vm3, %v517_v29, %v535_v54 }
 0x28d   :  { %v462_v1 = vsel %vm241_vm4, %v446_v44, %v461_v23 }
 0x28e   :  { %v492_v6 = vpop.permute.xlu1 %491  ;;  %v463_v10 = vsel %vm243_vm5, %v450_v48, %v462_v1 }
 0x28f   :  { %v464_v24 = vsel %vm245_vm6, %v454_v56, %v463_v10  ;;  %v521_v30 = vrot.slane %v492_v6, %v1069_v52 }
 0x290   :  { %v465_v16 = vsel %vm247_vm7, %v458_v61, %v464_v24 }
 0x291   :  { %v467_v25 = vsel %vm250_vm8, %v465_v16, 0.0  ;;  %v537_v53 = vsel %vm241_vm4, %v521_v30, %v536_v40 }
 0x292   :  { %468 = vadd.xlane.f32.xlu0 %v467_v25  ;;  %v495_v26 = vpop.permute.xlu1 %494 }
 0x293   :  { %v525_v34 = vrot.slane %v495_v26, %v1069_v52 }
 0x295   :  { %v538_v51 = vsel %vm243_vm5, %v525_v34, %v537_v53 }
 0x296   :  { %v498_v32 = vpop.permute.xlu1 %497 }
 0x297   :  { %v529_v11 = vrot.slane %v498_v32, %v1069_v52 }
 0x299   :  { %v539_v41 = vsel %vm245_vm6, %v529_v11, %v538_v51 }
 0x29a   :  { %v501_v19 = vpop.permute.xlu1 %500 }
 0x29b   :  { %v533_v21 = vrot.slane %v501_v19, %v1069_v52 }
 0x29d   :  { %v540_v42 = vsel %vm247_vm7, %v533_v21, %v539_v41 }
 0x29e   :  { %v542_v44 = vsel %vm250_vm8, %v540_v42, 0.0 }
 0x29f   :  { %543 = vadd.xlane.f32.xlu1 %v542_v44 }
 0x31f   :  { %v469_v48 = vpop.xlane.xlu0 %468 }
 0x32c   :  { %v544_v23 = vpop.xlane.xlu1 %543 }
 0x32d   :  { %v545_v56 = vadd.f32 %v544_v23, %v469_v48 }
 0x32f   :  { %890 = vrcp.f32 %v545_v56 }
 0x339   :  { %v891_v1 = vpop.eup %890 }
 0x33a   :  { %v556_v61 = vrot.slane %v891_v1, %v313_v45  ;;  %v560_v52 = vrot.slane %v891_v1, %v317_v13  ;;  %v564_v25 = vrot.slane %v891_v1, %v321_v7  ;;  %v552_v26 = vrot.slane %v891_v1, %v309_v46 }
 0x33c   :  { %v598_v6 = vmul.f32 %v1199_v58, %v556_v61  ;;  %v590_v10 = vmul.f32 %v1180_v35, %v556_v61  ;;  %v599_v24 = vmul.f32 %v1211_v60, %v560_v52  ;;  %v591_v16 = vmul.f32 %v1206_v59, %v560_v52 }
 0x33d   :  { %v592_v45 = vmul.f32 %v1216_v4, %v564_v25  ;;  %v589_v35 = vmul.f32 %v1182_v36, %v552_v26  ;;  %v600_v13 = vmul.f32 %v1221_v15, %v564_v25  ;;  %v597_v58 = vmul.f32 %v1190_v22, %v552_v26 }
 0x33e   :  { %653 = vperm.xlu1 %856, %v598_v6   ;;  %613 = vperm.xlu0 %857, %v590_v10   ;;  %v568_v59 = vrot.slane %v891_v1, %v325_v37  ;;  %v572_v60 = vrot.slane %v891_v1, %v329_v47  ;;  %v576_v22 = vrot.slane %v891_v1, %v333_v57 }
 0x340   :  { %v601_v7 = vmul.f32 %v1229_v62, %v568_v59  ;;  %v593_v46 = vmul.f32 %v1226_v17, %v568_v59  ;;  %v602_v36 = vmul.f32 %v1232_v31, %v572_v60  ;;  %v594_v4 = vmul.f32 %v1188_v39, %v572_v60 }
 0x341   :  { %v603_v37 = vmul.f32 %v1235_v9, %v576_v22  ;;  %v595_v15 = vmul.f32 %v1197_v43, %v576_v22  ;;  %v580_v17 = vrot.slane %v891_v1, %v337_v63 }
 0x342   :  { %658 = vperm.xlu1 %856, %v599_v24   ;;  %618 = vperm.xlu0 %857, %v591_v16  }
 0x343   :  { %v604_v47 = vmul.f32 %v1238_v38, %v580_v17  ;;  %v596_v62 = vmul.f32 %v1204_v55, %v580_v17 }
 0x346   :  { %623 = vperm.xlu1 %856, %v592_v45   ;;  %608 = vperm.xlu0 %857, %v589_v35  }
 0x34a   :  { %663 = vperm.xlu1 %856, %v600_v13   ;;  %648 = vperm.xlu0 %857, %v597_v58  }
 0x34e   :  { %668 = vperm.xlu1 %856, %v601_v7   ;;  %628 = vperm.xlu0 %857, %v593_v46  }
 0x352   :  { %673 = vperm.xlu1 %856, %v602_v36   ;;  %633 = vperm.xlu0 %857, %v594_v4  }
 0x356   :  { %678 = vperm.xlu1 %856, %v603_v37   ;;  %638 = vperm.xlu0 %857, %v595_v15  }
 0x35a   :  { %683 = vperm.xlu1 %856, %v604_v47   ;;  %643 = vperm.xlu0 %857, %v596_v62  }
 0x3bd   :  { %v654_v57 = vpop.permute.xlu1 %653  ;;  %v614_v39 = vpop.permute.xlu0 %613 }
 0x3be   :  { %v687_v31 = vsel %vm605_vm9, %v614_v39, %v654_v57 }
 0x3bf   :  { %v695_v43 = vmul.f32 %v687_v31, %v1015_v2 }
 0x3c1   :  { %v710_v50 = vsel %vm702_vm10, %v695_v43, 0.0  ;;  %v659_v63 = vpop.permute.xlu1 %658  ;;  %v619_v9 = vpop.permute.xlu0 %618 }
 0x3c2   :  { %v711_v3 = vrot.slane %v710_v50, 4  ;;  %v688_v55 = vsel %vm605_vm9, %v619_v9, %v659_v63 }
 0x3c3   :  { %v696_v38 = vmul.f32 %v688_v55, %v1018_v5 }
 0x3c4   :  { %v712_v27 = vadd.f32 %v711_v3, %v710_v50 }
 0x3c5   :  { %v717_v28 = vsel %vm702_vm10, %v696_v38, 0.0  ;;  %v624_v29 = vpop.permute.xlu1 %623  ;;  %v609_v30 = vpop.permute.xlu0 %608 }
 0x3c6   :  { %v718_v32 = vrot.slane %v717_v28, 4  ;;  %v713_v33 = vrot.slane %v712_v27, 2 }
 0x3c8   :  { %v714_v34 = vadd.f32 %v713_v33, %v712_v27  ;;  %v719_v54 = vadd.f32 %v718_v32, %v717_v28 }
 0x3c9   :  { %v664_v2 = vpop.permute.xlu1 %663  ;;  %v649_v11 = vpop.permute.xlu0 %648 }
 0x3ca   :  { %v689_v40 = vsel %vm605_vm9, %v624_v29, %v664_v2  ;;  %v686_v53 = vsel %vm605_vm9, %v609_v30, %v649_v11  ;;  %v715_v19 = vrot.slane %v714_v34, 1  ;;  %v720_v51 = vrot.slane %v719_v54, 2 }
 0x3cb   :  { %v697_v5 = vmul.f32 %v689_v40, %v1021_v8  ;;  %v694_v21 = vmul.f32 %v686_v53, %v1013_v0 }
 0x3cc   :  { %v1320_v41 = vadd.f32 %v715_v19, %v714_v34  ;;  %v721_v42 = vadd.f32 %v720_v51, %v719_v54 }
 0x3cd   :  { %v724_v44 = vsel %vm702_vm10, %v697_v5, 0.0  ;;  %v703_v48 = vsel %vm702_vm10, %v694_v21, 0.0  ;;  %v669_v23 = vpop.permute.xlu1 %668  ;;  %v629_v56 = vpop.permute.xlu0 %628 }
 0x3ce   :  { %v725_v1 = vrot.slane %v724_v44, 4  ;;  %v704_v61 = vrot.slane %v703_v48, 4  ;;  %v690_v6 = vsel %vm605_vm9, %v629_v56, %v669_v23  ;;  %769 = vrot.lane.b32.xlu0 %v1320_v41, %s965_s19  ;;  %v722_v8 = vrot.slane %v721_v42, 1 }
 0x3cf   :  { %v698_v0 = vmul.f32 %v690_v6, %v1027_v12 }
 0x3d0   :  { %v1329_v10 = vadd.f32 %v722_v8, %v721_v42  ;;  %v726_v52 = vadd.f32 %v725_v1, %v724_v44  ;;  %v705_v24 = vadd.f32 %v704_v61, %v703_v48 }
 0x3d1   :  { %v731_v16 = vsel %vm702_vm10, %v698_v0, 0.0  ;;  %v674_v25 = vpop.permute.xlu1 %673  ;;  %v634_v26 = vpop.permute.xlu0 %633 }
 0x3d2   :  { %v732_v45 = vrot.slane %v731_v16, 4  ;;  %v691_v35 = vsel %vm605_vm9, %v634_v26, %v674_v25  ;;  %771 = vrot.lane.b32.xlu1 %v1329_v10, %s965_s19  ;;  %v727_v13 = vrot.slane %v726_v52, 2  ;;  %v706_v58 = vrot.slane %v705_v24, 2 }
 0x3d3   :  { %v699_v59 = vmul.f32 %v691_v35, %v1029_v14 }
 0x3d4   :  { %v728_v12 = vadd.f32 %v727_v13, %v726_v52  ;;  %v707_v7 = vadd.f32 %v706_v58, %v705_v24  ;;  %v733_v46 = vadd.f32 %v732_v45, %v731_v16 }
 0x3d5   :  { %v738_v60 = vsel %vm702_vm10, %v699_v59, 0.0  ;;  %v679_v36 = vpop.permute.xlu1 %678  ;;  %v639_v4 = vpop.permute.xlu0 %638 }
 0x3d6   :  { %v739_v22 = vrot.slane %v738_v60, 4  ;;  %v692_v37 = vsel %vm605_vm9, %v639_v4, %v679_v36  ;;  %v729_v15 = vrot.slane %v728_v12, 1  ;;  %v708_v17 = vrot.slane %v707_v7, 1 }
 0x3d7   :  { %v700_v47 = vmul.f32 %v692_v37, %v1035_v18  ;;  %v734_v62 = vrot.slane %v733_v46, 2 }
 0x3d8   :  { %v730_v57 = vadd.f32 %v729_v15, %v728_v12  ;;  %v709_v39 = vadd.f32 %v708_v17, %v707_v7  ;;  %v740_v31 = vadd.f32 %v739_v22, %v738_v60 }
 0x3d9   :  { %v745_v14 = vsel %vm702_vm10, %v700_v47, 0.0  ;;  %v684_v43 = vpop.permute.xlu1 %683  ;;  %v644_v50 = vpop.permute.xlu0 %643  ;;  %v735_v63 = vadd.f32 %v734_v62, %v733_v46 }
 0x3da   :  { %v746_v9 = vrot.slane %v745_v14, 4  ;;  %v693_v3 = vsel %vm605_vm9, %v644_v50, %v684_v43  ;;  %773 = vrot.lane.b32.xlu1 %v730_v57, %s965_s19  ;;  %767 = vrot.lane.b32.xlu0 %v709_v39, %s965_s19  ;;  %v741_v55 = vrot.slane %v740_v31, 2 }
 0x3db   :  { %v701_v18 = vmul.f32 %v693_v3, %v1037_v20  ;;  %v736_v38 = vrot.slane %v735_v63, 1 }
 0x3dc   :  { %v742_v27 = vadd.f32 %v741_v55, %v740_v31  ;;  %v747_v28 = vadd.f32 %v746_v9, %v745_v14 }
 0x3dd   :  { %v752_v29 = vsel %vm702_vm10, %v701_v18, 0.0  ;;  %v737_v30 = vadd.f32 %v736_v38, %v735_v63 }
 0x3de   :  { %v753_v32 = vrot.slane %v752_v29, 4  ;;  %v743_v33 = vrot.slane %v742_v27, 1  ;;  %v748_v34 = vrot.slane %v747_v28, 2 }
 0x3df   :  { %775 = vrot.lane.b32.xlu0 %v737_v30, %s965_s19 }
 0x3e0   :  { %v744_v49 = vadd.f32 %v743_v33, %v742_v27  ;;  %v749_v54 = vadd.f32 %v748_v34, %v747_v28  ;;  %v754_v2 = vadd.f32 %v753_v32, %v752_v29 }
 0x3e2   :  { %777 = vrot.lane.b32.xlu1 %v744_v49, %s965_s19  ;;  %v750_v11 = vrot.slane %v749_v54, 1  ;;  %v755_v40 = vrot.slane %v754_v2, 2 }
 0x3e4   :  { %v751_v53 = vadd.f32 %v750_v11, %v749_v54  ;;  %v756_v20 = vadd.f32 %v755_v40, %v754_v2 }
 0x3e6   :  { %779 = vrot.lane.b32.xlu0 %v751_v53, %s965_s19  ;;  %v757_v19 = vrot.slane %v756_v20, 1 }
 0x3e8   :  { %v758_v51 = vadd.f32 %v757_v19, %v756_v20 }
 0x3ea   :  { %781 = vrot.lane.b32.xlu1 %v758_v51, %s965_s19 }
 0x440   :  { %v770_v5 = vpop.permute.xlu0 %769 }
 0x441   :  { %v792_v48 = vadd.f32 %v770_v5, %v1320_v41 }
 0x443   :  { %v807_v6 = vrot.slane %v792_v48, 7 }
 0x444   :  { %v772_v21 = vpop.permute.xlu1 %771 }
 0x445   :  { %v793_v1 = vadd.f32 %v772_v21, %v1329_v10 }
 0x447   :  { %v809_v16 = vrot.slane %v793_v1, 6 }
 0x44c   :  { %v768_v42 = vpop.permute.xlu0 %767  ;;  %v774_v44 = vpop.permute.xlu1 %773 }
 0x44d   :  { %v791_v23 = vadd.f32 %v768_v42, %v709_v39  ;;  %v794_v8 = vadd.f32 %v774_v44, %v730_v57 }
 0x44f   :  { %v808_v52 = vsel %vm235_vm1, %v807_v6, %v791_v23  ;;  %v811_v26 = vrot.slane %v794_v8, 5 }
 0x450   :  { %v810_v35 = vsel %vm237_vm2, %v809_v16, %v808_v52 }
 0x451   :  { %v776_v56 = vpop.permute.xlu0 %775  ;;  %v812_v12 = vsel %vm239_vm3, %v811_v26, %v810_v35 }
 0x452   :  { %v795_v0 = vadd.f32 %v776_v56, %v737_v30 }
 0x454   :  { %v778_v61 = vpop.permute.xlu1 %777  ;;  %v813_v13 = vrot.slane %v795_v0, 4 }
 0x455   :  { %v796_v24 = vadd.f32 %v778_v61, %v744_v49 }
 0x456   :  { %v814_v7 = vsel %vm241_vm4, %v813_v13, %v812_v12 }
 0x457   :  { %v815_v58 = vrot.slane %v796_v24, 3 }
 0x458   :  { %v780_v25 = vpop.permute.xlu0 %779 }
 0x459   :  { %v797_v45 = vadd.f32 %v780_v25, %v751_v53  ;;  %v816_v46 = vsel %vm243_vm5, %v815_v58, %v814_v7 }
 0x45b   :  { %v817_v41 = vrot.slane %v797_v45, 2 }
 0x45c   :  { %v782_v59 = vpop.permute.xlu1 %781 }
 0x45d   :  { %v798_v10 = vadd.f32 %v782_v59, %v758_v51  ;;  %v818_v36 = vsel %vm245_vm6, %v817_v41, %v816_v46 }
 0x45f   :  { %v819_v60 = vrot.slane %v798_v10, 1 }
 0x461   :  { %v820_v4 = vsel %vm247_vm7, %v819_v60, %v818_v36 }
 0x462   :  { %823 = vst.msk [vmem:[#allocation7] sm:$0xff] %vm822_vm11, %v820_v4 }
 0x463   :  { %947 = shalt.err (!%p944_p6)
}
 0x464   :  { %s948_s12 = scalar_lea.hbm %s1375_s2, 128 }
 0x465   :  { %p949_p7 = scmp.ne.s32.totalorder %s1375_s2, %s948_s12  ;;  %p952_p8 = scmp.lt.u32.totalorder %s948_s12, %s1375_s2 }
 0x467   :  { %p954_p9 = pnand %p952_p8, %p949_p7 }
 0x469   :  { %957 = shalt.err (!%p954_p9)
}
 0x46a   :  { %833 = dma.vmem_to_hbm [thread:$0]  %s831_s8, 128, %s1375_s2, [#allocation4]  }
 0x46b   :  { %962 = dma.done.wait [#allocation4], 128  }
 0x46c   :  { %963 = vsyncadd [#allocation4], 4294967168 }
 0x46d   :  { %837 = vsyncpa [#allocation3], 1 }
 0x46e   :  { %838 = vsyncpa [#allocation6], 1 }
 0x46f   :  { %839 = vsyncpa [#allocation4], 1 }

</bundles_post_ra>
